<compile_context>
chip_gen: v6e
topology: v6e:2x2x1
jax: 0.10.0
libtpu: 0.0.40
codegen_flags: <defaults>
</compile_context>

<pallas_src>
import functools

import jax
import jax.numpy as jnp
from jax.experimental import pallas as pl
from jax.experimental.pallas import tpu as pltpu

INPUT_SIZE = 784
HIDDEN_SIZE = 600
NUM_CLASSES = 10

# Lane-aligned (multiple-of-128) padded dims; padded rows/cols are zero.
HIDDEN_PAD = 640   # 600 -> 5 * 128
OUT_PAD = 128      # 10  -> 1 * 128


def _round_up(x, m):
    return (x + m - 1) // m * m


def mlp_kernel(x_ref, w1_ref, b1_ref, w2_ref, b2_ref, o_ref):
    # fc1: bf16 MXU matmul with f32 accumulation, bias + ReLU in f32 (VPU)
    h = jnp.dot(x_ref[...], w1_ref[...], preferred_element_type=jnp.float32)
    h = jnp.maximum(h + b1_ref[...], 0.0)
    # fc2: cast activations back to bf16 for the MXU, accumulate/add bias in f32
    out = jnp.dot(h.astype(w2_ref.dtype), w2_ref[...],
                  preferred_element_type=jnp.float32)
    o_ref[...] = (out + b2_ref[...]).astype(o_ref.dtype)


@functools.partial(jax.jit, static_argnames=("block_m",))
def net_forward(x, w1, b1, w2, b2, *, block_m=256):
    """Forward pass of Net: relu(x @ w1 + b1) @ w2 + b2.

    x : (B, 784) float32
    w1: (784, 600), b1: (600,)   -- (in_features, out_features) layout
    w2: (600, 10),  b2: (10,)
    """
    B = x.shape[0]

    # Zero-pad hidden / output dims to 128-lane multiples (numerically exact:
    # padded hidden units have zero weight and zero bias => ReLU(0) = 0).
    w1p = (jnp.zeros((INPUT_SIZE, HIDDEN_PAD), jnp.bfloat16)
           .at[:, :HIDDEN_SIZE].set(w1.astype(jnp.bfloat16)))
    b1p = jnp.zeros((1, HIDDEN_PAD), jnp.float32).at[0, :HIDDEN_SIZE].set(b1)
    w2p = (jnp.zeros((HIDDEN_PAD, OUT_PAD), jnp.bfloat16)
           .at[:HIDDEN_SIZE, :NUM_CLASSES].set(w2.astype(jnp.bfloat16)))
    b2p = jnp.zeros((1, OUT_PAD), jnp.float32).at[0, :NUM_CLASSES].set(b2)

    # Batch tiling: tile <= block_m rows, multiple of 8; pad B up to a multiple.
    tm = min(block_m, _round_up(B, 8))
    b_pad = _round_up(B, tm)
    xp = x.astype(jnp.bfloat16)
    if b_pad != B:
        xp = jnp.pad(xp, ((0, b_pad - B), (0, 0)))

    out = pl.pallas_call(
        mlp_kernel,
        out_shape=jax.ShapeDtypeStruct((b_pad, OUT_PAD), jnp.float32),
        grid=(b_pad // tm,),
        in_specs=[
            # batch tile of activations marches with the grid ...
            pl.BlockSpec((tm, INPUT_SIZE), lambda i: (i, 0)),
            # ... while weights / biases stay VMEM-resident (constant index map)
            pl.BlockSpec((INPUT_SIZE, HIDDEN_PAD), lambda i: (0, 0)),
            pl.BlockSpec((1, HIDDEN_PAD), lambda i: (0, 0)),
            pl.BlockSpec((HIDDEN_PAD, OUT_PAD), lambda i: (0, 0)),
            pl.BlockSpec((1, OUT_PAD), lambda i: (0, 0)),
        ],
        out_specs=pl.BlockSpec((tm, OUT_PAD), lambda i: (i, 0)),
        compiler_params=pltpu.CompilerParams(
            dimension_semantics=("parallel",),
        ),
    )(xp, w1p, b1p, w2p, b2p)

    # Strip batch and class padding.
    return out[:B, :NUM_CLASSES]


def init_params(key):
    """Deterministic init matching nn.Linear's default U(-1/sqrt(fan_in), ...)."""
    k1, k2, k3, k4 = jax.random.split(key, 4)
    bound1 = 1.0 / jnp.sqrt(jnp.float32(INPUT_SIZE))
    bound2 = 1.0 / jnp.sqrt(jnp.float32(HIDDEN_SIZE))
    # Stored already transposed: (in_features, out_features)
    w1 = jax.random.uniform(k1, (INPUT_SIZE, HIDDEN_SIZE), jnp.float32, -bound1, bound1)
    b1 = jax.random.uniform(k2, (HIDDEN_SIZE,), jnp.float32, -bound1, bound1)
    w2 = jax.random.uniform(k3, (HIDDEN_SIZE, NUM_CLASSES), jnp.float32, -bound2, bound2)
    b2 = jax.random.uniform(k4, (NUM_CLASSES,), jnp.float32, -bound2, bound2)
    return w1, b1, w2, b2


if __name__ == "__main__":
    key = jax.random.PRNGKey(0)
    kx, kx2, kp = jax.random.split(key, 3)

    w1, b1, w2, b2 = init_params(kp)

    def reference(xx):  # pure-JAX f32 reference
        return jnp.maximum(xx @ w1 + b1, 0.0) @ w2 + b2

    # Small batch (single tile, no padding).
    batch = 8
    x = jax.random.normal(kx, (batch, INPUT_SIZE), dtype=jnp.float32)
    out = net_forward(x, w1, b1, w2, b2)
    jax.block_until_ready(out)
    ref = reference(x)
    assert out.shape == (batch, NUM_CLASSES)
    assert jnp.allclose(out, ref, atol=3e-2, rtol=3e-2), \
        float(jnp.max(jnp.abs(out - ref)))

    # Larger, non-tile-multiple batch: exercises the grid + batch-padding path.
    batch2 = 300
    x2 = jax.random.normal(kx2, (batch2, INPUT_SIZE), dtype=jnp.float32)
    out2 = net_forward(x2, w1, b1, w2, b2)
    jax.block_until_ready(out2)
    ref2 = reference(x2)
    assert out2.shape == (batch2, NUM_CLASSES)
    assert jnp.allclose(out2, ref2, atol=3e-2, rtol=3e-2), \
        float(jnp.max(jnp.abs(out2 - ref2)))

    print("KERNEL_OK")
</pallas_src>

<mosaic_0001>
module attributes {stable_mosaic.version = 11 : i64} {
  func.func @mlp_kernel(%arg0: i32, %arg1: memref<8x784xbf16, #tpu.memory_space<vmem>>, %arg2: memref<784x640xbf16, #tpu.memory_space<vmem>>, %arg3: memref<1x640xf32, #tpu.memory_space<vmem>>, %arg4: memref<640x128xbf16, #tpu.memory_space<vmem>>, %arg5: memref<1x128xf32, #tpu.memory_space<vmem>>, %arg6: memref<8x128xf32, #tpu.memory_space<vmem>>) attributes {dimension_semantics = [#tpu.dimension_semantics<parallel>], iteration_bounds = array<i64: 1>, scalar_prefetch = 0 : i64, scratch_operands = 0 : i64, tpu.core_type = #tpu.core_type<tc>, window_params = [{transform_indices = @transform_0, window_bounds = array<i64: 8, 784>}, {pipeline_mode = #tpu.pipeline_mode<synchronous>, transform_indices = @transform_1, window_bounds = array<i64: 784, 640>}, {pipeline_mode = #tpu.pipeline_mode<synchronous>, transform_indices = @transform_2, window_bounds = array<i64: 1, 640>}, {pipeline_mode = #tpu.pipeline_mode<synchronous>, transform_indices = @transform_3, window_bounds = array<i64: 640, 128>}, {pipeline_mode = #tpu.pipeline_mode<synchronous>, transform_indices = @transform_4, window_bounds = array<i64: 1, 128>}, {transform_indices = @transform_5, window_bounds = array<i64: 8, 128>}]} {
    %c0 = arith.constant 0 : index
    %c0_0 = arith.constant 0 : index
    %0 = vector.load %arg1[%c0, %c0_0] : memref<8x784xbf16, #tpu.memory_space<vmem>>, vector<8x784xbf16>
    %c0_1 = arith.constant 0 : index
    %c0_2 = arith.constant 0 : index
    %1 = vector.load %arg2[%c0_1, %c0_2] : memref<784x640xbf16, #tpu.memory_space<vmem>>, vector<784x640xbf16>
    %cst = arith.constant dense<0.000000e+00> : vector<8x640xf32>
    %2 = tpu.matmul %0, %1, %cst {dimension_numbers = #tpu.dot_dimension_numbers<[1], [0], [0], [1], [0, 0, 1, 1], [], []>} : vector<8x784xbf16>, vector<784x640xbf16>, vector<8x640xf32> -> vector<8x640xf32>
    %c0_3 = arith.constant 0 : index
    %c0_4 = arith.constant 0 : index
    %3 = vector.load %arg3[%c0_3, %c0_4] : memref<1x640xf32, #tpu.memory_space<vmem>>, vector<1x640xf32>
    %4 = vector.broadcast %3 : vector<1x640xf32> to vector<8x640xf32>
    %5 = arith.addf %2, %4 : vector<8x640xf32>
    %cst_5 = arith.constant 0.000000e+00 : f32
    %6 = vector.broadcast %cst_5 : f32 to vector<8x640xf32>
    %7 = arith.maximumf %5, %6 : vector<8x640xf32>
    %8 = arith.truncf %7 : vector<8x640xf32> to vector<8x640xbf16>
    %c0_6 = arith.constant 0 : index
    %c0_7 = arith.constant 0 : index
    %9 = vector.load %arg4[%c0_6, %c0_7] : memref<640x128xbf16, #tpu.memory_space<vmem>>, vector<640x128xbf16>
    %cst_8 = arith.constant dense<0.000000e+00> : vector<8x128xf32>
    %10 = tpu.matmul %8, %9, %cst_8 {dimension_numbers = #tpu.dot_dimension_numbers<[1], [0], [0], [1], [0, 0, 1, 1], [], []>} : vector<8x640xbf16>, vector<640x128xbf16>, vector<8x128xf32> -> vector<8x128xf32>
    %c0_9 = arith.constant 0 : index
    %c0_10 = arith.constant 0 : index
    %11 = vector.load %arg5[%c0_9, %c0_10] : memref<1x128xf32, #tpu.memory_space<vmem>>, vector<1x128xf32>
    %12 = vector.broadcast %11 : vector<1x128xf32> to vector<8x128xf32>
    %13 = arith.addf %10, %12 : vector<8x128xf32>
    %c0_11 = arith.constant 0 : index
    %c0_12 = arith.constant 0 : index
    %14 = vector.load %arg6[%c0_11, %c0_12] : memref<8x128xf32, #tpu.memory_space<vmem>>, vector<8x128xf32>
    tpu.vector_store %arg6[%c0_11, %c0_12], %13 {strides = array<i32>} : memref<8x128xf32, #tpu.memory_space<vmem>>, vector<8x128xf32>,
    return
  }
  func.func @transform_0(%arg0: i32) -> (i32, i32) {
    %c0_i32 = arith.constant 0 : i32
    %c0_i32_0 = arith.constant 0 : i32
    return %arg0, %c0_i32 : i32, i32
  }
  func.func @transform_1(%arg0: i32) -> (i32, i32) {
    %c0_i32 = arith.constant 0 : i32
    %c0_i32_0 = arith.constant 0 : i32
    %c0_i32_1 = arith.constant 0 : i32
    return %c0_i32, %c0_i32_0 : i32, i32
  }
  func.func @transform_2(%arg0: i32) -> (i32, i32) {
    %c0_i32 = arith.constant 0 : i32
    %c0_i32_0 = arith.constant 0 : i32
    %c0_i32_1 = arith.constant 0 : i32
    return %c0_i32, %c0_i32_0 : i32, i32
  }
  func.func @transform_3(%arg0: i32) -> (i32, i32) {
    %c0_i32 = arith.constant 0 : i32
    %c0_i32_0 = arith.constant 0 : i32
    %c0_i32_1 = arith.constant 0 : i32
    return %c0_i32, %c0_i32_0 : i32, i32
  }
  func.func @transform_4(%arg0: i32) -> (i32, i32) {
    %c0_i32 = arith.constant 0 : i32
    %c0_i32_0 = arith.constant 0 : i32
    %c0_i32_1 = arith.constant 0 : i32
    return %c0_i32, %c0_i32_0 : i32, i32
  }
  func.func @transform_5(%arg0: i32) -> (i32, i32) {
    %c0_i32 = arith.constant 0 : i32
    %c0_i32_0 = arith.constant 0 : i32
    return %arg0, %c0_i32 : i32, i32
  }
}

</mosaic_0001>

<bundles_post_ra>
// kernel: net_forward.1
= control target key start
LH: loop header
LB: loop body
LE: loop exit
PB: predicated region body
PF: predicated region fallthrough
CT: control target
= control target key end

     0   :  { %vm1645_vm0 = vcmask 130048   ;;  %s4466_s0 = inlined_call_operand.vmem [shape: bf16[8,784], index: 0, kind: input, shape index: {}]   ;;  %s4467_s1 = inlined_call_operand.vmem [shape: bf16[784,640], index: 1, kind: input, shape index: {}]   ;;  %s4468_s2 = inlined_call_operand.vmem [shape: f32[1,640], index: 2, kind: input, shape index: {}]   ;;  %s4469_s3 = inlined_call_operand.vmem [shape: bf16[640,128], index: 3, kind: input, shape index: {}]   ;;  %s4470_s4 = inlined_call_operand.vmem [shape: f32[1,128], index: 4, kind: input, shape index: {}]   ;;  %s4471_s5 = inlined_call_operand.hbm [shape: f32[8,128], index: 5, kind: output, shape index: {}]  }
   0x1   :  { %v3056_v0 = vld [vmem:[%s4467_s1 + $0x11c] ss:$20 sps:$4 sm:$0xff]   ;;  %v3060_v2 = vld [vmem:[%s4467_s1 + $0x118] ss:$20 sps:$4 sm:$0xff]   ;;  %v3062_v4 = vld [vmem:[%s4467_s1 + $0xf4] ss:$20 sps:$4 sm:$0xff]  }
   0x2   :  { %v3058_v1 = vld [vmem:[%s4467_s1 + $0x39c] ss:$20 sps:$4 sm:$0xff]   ;;  %1649 = vmatprep.subr.bf16.mxu0 %v3056_v0  ;;  %v3061_v3 = vld [vmem:[%s4467_s1 + $0x398] ss:$20 sps:$4 sm:$0xff]   ;;  %v3064_v5 = vld [vmem:[%s4467_s1 + $0x374] ss:$20 sps:$4 sm:$0xff]  }
   0x3   :  { %1690 = vmatprep.subr.bf16.mxu1 %v3058_v1  ;;  %1650 = vmatpush1.bf16.msra.mxu0 %v3060_v2  ;;  %v3066_v6 = vld [vmem:[%s4467_s1 + $0xf0] ss:$20 sps:$4 sm:$0xff]   ;;  %v3068_v8 = vld [vmem:[%s4467_s1 + $0xcc] ss:$20 sps:$4 sm:$0xff]   ;;  %v3072_v10 = vld [vmem:[%s4467_s1 + $0xc8] ss:$20 sps:$4 sm:$0xff]  }
   0x4   :  { %1691 = vmatpush1.bf16.msra.mxu1 %v3061_v3  ;;  %1651 = vmatprep.subr.bf16.mxu0 %v3062_v4  ;;  %v3067_v7 = vld [vmem:[%s4467_s1 + $0x370] ss:$20 sps:$4 sm:$0xff]   ;;  %v3070_v9 = vld [vmem:[%s4467_s1 + $0x34c] ss:$20 sps:$4 sm:$0xff]   ;;  %v3073_v11 = vld [vmem:[%s4467_s1 + $0x348] ss:$20 sps:$4 sm:$0xff]  }
   0x5   :  { %1692 = vmatprep.subr.bf16.mxu1 %v3064_v5  ;;  %v3074_v12 = vld [vmem:[%s4467_s1 + $0xa4] ss:$20 sps:$4 sm:$0xff]   ;;  %v3078_v14 = vld [vmem:[%s4467_s1 + $0xa0] ss:$20 sps:$4 sm:$0xff]   ;;  %v3080_v16 = vld [vmem:[%s4467_s1 + $0x7c] ss:$20 sps:$4 sm:$0xff]  }
   0x6   :  { %v3076_v13 = vld [vmem:[%s4467_s1 + $0x324] ss:$20 sps:$4 sm:$0xff]   ;;  %v3079_v15 = vld [vmem:[%s4467_s1 + $0x320] ss:$20 sps:$4 sm:$0xff]   ;;  %v3082_v17 = vld [vmem:[%s4467_s1 + $0x2fc] ss:$20 sps:$4 sm:$0xff]  }
   0x7   :  { %1652 = vmatpush1.bf16.msra.mxu0 %v3066_v6  ;;  %v3084_v18 = vld [vmem:[%s4467_s1 + $0x78] ss:$20 sps:$4 sm:$0xff]   ;;  %v3086_v20 = vld [vmem:[%s4467_s1 + $0x54] ss:$20 sps:$4 sm:$0xff]   ;;  %v3090_v22 = vld [vmem:[%s4467_s1 + $0x50] ss:$20 sps:$4 sm:$0xff]  }
   0x8   :  { %1693 = vmatpush1.bf16.msra.mxu1 %v3067_v7  ;;  %1653 = vmatprep.subr.bf16.mxu0 %v3068_v8  ;;  %v3085_v19 = vld [vmem:[%s4467_s1 + $0x2f8] ss:$20 sps:$4 sm:$0xff]   ;;  %v3088_v21 = vld [vmem:[%s4467_s1 + $0x2d4] ss:$20 sps:$4 sm:$0xff]   ;;  %v3091_v23 = vld [vmem:[%s4467_s1 + $0x2d0] ss:$20 sps:$4 sm:$0xff]  }
   0x9   :  { %1694 = vmatprep.subr.bf16.mxu1 %v3070_v9  ;;  %v3092_v24 = vld [vmem:[%s4467_s1 + $0x2c] ss:$20 sps:$4 sm:$0xff]   ;;  %v3096_v26 = vld [vmem:[%s4467_s1 + $0x28] ss:$20 sps:$4 sm:$0xff]   ;;  %v3098_v28 = vld [vmem:[%s4467_s1 + $0x4] ss:$20 sps:$4 sm:$0xff]  }
   0xa   :  { %v3094_v25 = vld [vmem:[%s4467_s1 + $0x2ac] ss:$20 sps:$4 sm:$0xff]   ;;  %v3097_v27 = vld [vmem:[%s4467_s1 + $0x2a8] ss:$20 sps:$4 sm:$0xff]   ;;  %v3100_v29 = vld [vmem:[%s4467_s1 + $0x284] ss:$20 sps:$4 sm:$0xff]  }
   0xb   :  { %1654 = vmatpush1.bf16.msra.mxu0 %v3072_v10  ;;  %v3102_v30 = vld [vmem:[%s4467_s1] ss:$20 sps:$4 sm:$0xff]   ;;  %v3104_v32 = vld [vmem:[%s4467_s1 + $0x25c] ss:$20 sps:$4 sm:$0xff]   ;;  %v3108_v34 = vld [vmem:[%s4467_s1 + $0x258] ss:$20 sps:$4 sm:$0xff]  }
   0xc   :  { %1695 = vmatpush1.bf16.msra.mxu1 %v3073_v11  ;;  %1655 = vmatprep.subr.bf16.mxu0 %v3074_v12  ;;  %v3103_v31 = vld [vmem:[%s4467_s1 + $0x280] ss:$20 sps:$4 sm:$0xff]   ;;  %v3106_v33 = vld [vmem:[%s4467_s1 + $0x4dc] ss:$20 sps:$4 sm:$0xff]   ;;  %v3109_v35 = vld [vmem:[%s4467_s1 + $0x4d8] ss:$20 sps:$4 sm:$0xff]  }
   0xd   :  { %1696 = vmatprep.subr.bf16.mxu1 %v3076_v13  ;;  %v3110_v36 = vld [vmem:[%s4467_s1 + $0x234] ss:$20 sps:$4 sm:$0xff]   ;;  %v3114_v38 = vld [vmem:[%s4467_s1 + $0x230] ss:$20 sps:$4 sm:$0xff]   ;;  %v3116_v40 = vld [vmem:[%s4467_s1 + $0x20c] ss:$20 sps:$4 sm:$0xff]  }
   0xe   :  { %v3112_v37 = vld [vmem:[%s4467_s1 + $0x4b4] ss:$20 sps:$4 sm:$0xff]   ;;  %v3115_v39 = vld [vmem:[%s4467_s1 + $0x4b0] ss:$20 sps:$4 sm:$0xff]   ;;  %v3118_v41 = vld [vmem:[%s4467_s1 + $0x48c] ss:$20 sps:$4 sm:$0xff]  }
   0xf   :  { %1656 = vmatpush1.bf16.msra.mxu0 %v3078_v14  ;;  %v3120_v42 = vld [vmem:[%s4467_s1 + $0x208] ss:$20 sps:$4 sm:$0xff]   ;;  %v3122_v44 = vld [vmem:[%s4467_s1 + $0x1e4] ss:$20 sps:$4 sm:$0xff]   ;;  %v3126_v49 = vld [vmem:[%s4467_s1 + $0x1e0] ss:$20 sps:$4 sm:$0xff]  }
  0x10   :  { %1697 = vmatpush1.bf16.msra.mxu1 %v3079_v15  ;;  %1657 = vmatprep.subr.bf16.mxu0 %v3080_v16  ;;  %v3121_v43 = vld [vmem:[%s4467_s1 + $0x488] ss:$20 sps:$4 sm:$0xff]   ;;  %v3124_v45 = vld [vmem:[%s4467_s1 + $0x464] ss:$20 sps:$4 sm:$0xff]   ;;  %v3127_v50 = vld [vmem:[%s4467_s1 + $0x460] ss:$20 sps:$4 sm:$0xff]  }
  0x11   :  { %1698 = vmatprep.subr.bf16.mxu1 %v3082_v17  ;;  %v22_v46 = vld [vmem:[%s4466_s0] sm:$0xff]  ;;  %v23_v48 = vld [vmem:[%s4466_s0 + $0x8] sm:$0xff]  ;;  %v3128_v52 = vld [vmem:[%s4467_s1 + $0x1bc] ss:$20 sps:$4 sm:$0xff]   ;;  %v3469_v13 = vmov 0  }
  0x12   :  { %v3644_v47 = vcombine.high %v22_v46, %v22_v46  ;;  %v3655_v51 = vcombine.high %v23_v48, %v23_v48  ;;  %v3130_v53 = vld [vmem:[%s4467_s1 + $0x43c] ss:$20 sps:$4 sm:$0xff]   ;;  %v3132_v54 = vld [vmem:[%s4467_s1 + $0x1b8] ss:$20 sps:$4 sm:$0xff]   ;;  %v3134_v56 = vld [vmem:[%s4467_s1 + $0x194] ss:$20 sps:$4 sm:$0xff]   ;;  %v3713_v6 = vcombine.low %v22_v46, %v22_v46  ;;  %v3715_v7 = vcombine.low %v23_v48, %v23_v48 }
  0x13   :  { %1658 = vmatpush1.bf16.msra.mxu0 %v3084_v18  ;;  %v3133_v55 = vld [vmem:[%s4467_s1 + $0x438] ss:$20 sps:$4 sm:$0xff]   ;;  %v3136_v57 = vld [vmem:[%s4467_s1 + $0x414] ss:$20 sps:$4 sm:$0xff]   ;;  %v3138_v58 = vld [vmem:[%s4467_s1 + $0x190] ss:$20 sps:$4 sm:$0xff]  }
  0x14   :  { %1699 = vmatpush1.bf16.msra.mxu1 %v3085_v19  ;;  %1659 = vmatprep.subr.bf16.mxu0 %v3086_v20  ;;  %v3139_v59 = vld [vmem:[%s4467_s1 + $0x410] ss:$20 sps:$4 sm:$0xff]   ;;  %v3140_v60 = vld [vmem:[%s4467_s1 + $0x16c] ss:$20 sps:$4 sm:$0xff]   ;;  %v3144_v62 = vld [vmem:[%s4467_s1 + $0x168] ss:$20 sps:$4 sm:$0xff]  }
  0x15   :  { %1700 = vmatprep.subr.bf16.mxu1 %v3088_v21  ;;  %1681 = vmatprep.mubr.bf16.mxu0 %v3644_v47  ;;  %v3142_v61 = vld [vmem:[%s4467_s1 + $0x3ec] ss:$20 sps:$4 sm:$0xff]   ;;  %v3145_v63 = vld [vmem:[%s4467_s1 + $0x3e8] ss:$20 sps:$4 sm:$0xff]   ;;  %v3146_v0 = vld [vmem:[%s4467_s1 + $0x144] ss:$20 sps:$4 sm:$0xff]  }
  0x16   :  { %1722 = vmatprep.mubr.bf16.mxu1 %v3655_v51  ;;  %v3148_v1 = vld [vmem:[%s4467_s1 + $0x3c4] ss:$20 sps:$4 sm:$0xff]   ;;  %v3150_v2 = vld [vmem:[%s4467_s1 + $0x140] ss:$20 sps:$4 sm:$0xff]   ;;  %v3158_v4 = vld [vmem:[%s4467_s1 + $0x61c] ss:$20 sps:$4 sm:$0xff]  }
  0x17   :  { %1660 = vmatpush1.bf16.msra.mxu0 %v3090_v22  ;;  %v3151_v3 = vld [vmem:[%s4467_s1 + $0x3c0] ss:$20 sps:$4 sm:$0xff]   ;;  %v3161_v5 = vld [vmem:[%s4467_s1 + $0x784] ss:$20 sps:$4 sm:$0xff]   ;;  %v3168_v16 = vld [vmem:[%s4467_s1 + $0x5c8] ss:$20 sps:$4 sm:$0xff]  }
  0x18   :  { %1701 = vmatpush1.bf16.msra.mxu1 %v3091_v23  ;;  %1661 = vmatprep.subr.bf16.mxu0 %v3092_v24  ;;  %v3156_v8 = vld [vmem:[%s4467_s1 + $0x618] ss:$20 sps:$4 sm:$0xff]   ;;  %v3159_v9 = vld [vmem:[%s4467_s1 + $0x780] ss:$20 sps:$4 sm:$0xff]   ;;  %v3162_v12 = vld [vmem:[%s4467_s1 + $0x5f0] ss:$20 sps:$4 sm:$0xff]  }
  0x19   :  { %1702 = vmatprep.subr.bf16.mxu1 %v3094_v25  ;;  %v3164_v10 = vld [vmem:[%s4467_s1 + $0x5f4] ss:$20 sps:$4 sm:$0xff]   ;;  %v3167_v11 = vld [vmem:[%s4467_s1 + $0x124] ss:$20 sps:$4 sm:$0xff]   ;;  %v3170_v14 = vld [vmem:[%s4467_s1 + $0x5cc] ss:$20 sps:$4 sm:$0xff]  }
  0x1a   :  { %v3165_v15 = vld [vmem:[%s4467_s1 + $0x120] ss:$20 sps:$4 sm:$0xff]   ;;  %v3747_v17 = vld [vmem:[%s4466_s0 + $0x18] ss:$0 sps:$4 sm:$0xff]   ;;  %v3174_v18 = vld [vmem:[%s4467_s1 + $0xfc] ss:$20 sps:$4 sm:$0xff]  }
  0x1b   :  { %1662 = vmatpush1.bf16.msra.mxu0 %v3096_v26  ;;  %v3177_v19 = vld [vmem:[%s4467_s1 + $0x5a4] ss:$20 sps:$4 sm:$0xff]   ;;  %v3175_v21 = vld [vmem:[%s4467_s1 + $0x5a0] ss:$20 sps:$4 sm:$0xff]   ;;  %v3183_v23 = vld [vmem:[%s4467_s1 + $0x57c] ss:$20 sps:$4 sm:$0xff]  }
  0x1c   :  { %1703 = vmatpush1.bf16.msra.mxu1 %v3097_v27  ;;  %1663 = vmatprep.subr.bf16.mxu0 %v3098_v28  ;;  %v3172_v20 = vld [vmem:[%s4467_s1 + $0xf8] ss:$20 sps:$4 sm:$0xff]   ;;  %v3180_v22 = vld [vmem:[%s4467_s1 + $0xd4] ss:$20 sps:$4 sm:$0xff]   ;;  %v3178_v24 = vld [vmem:[%s4467_s1 + $0xd0] ss:$20 sps:$4 sm:$0xff]  }
  0x1d   :  { %1704 = vmatprep.subr.bf16.mxu1 %v3100_v29  ;;  %v3181_v25 = vld [vmem:[%s4467_s1 + $0x578] ss:$20 sps:$4 sm:$0xff]   ;;  %v3189_v27 = vld [vmem:[%s4467_s1 + $0x554] ss:$20 sps:$4 sm:$0xff]   ;;  %v3187_v29 = vld [vmem:[%s4467_s1 + $0x550] ss:$20 sps:$4 sm:$0xff]  }
  0x1e   :  { %v3186_v26 = vld [vmem:[%s4467_s1 + $0xac] ss:$20 sps:$4 sm:$0xff]   ;;  %v3184_v28 = vld [vmem:[%s4467_s1 + $0xa8] ss:$20 sps:$4 sm:$0xff]   ;;  %v3211_v48 = vld [vmem:[%s4467_s1 + $0x730] ss:$20 sps:$4 sm:$0xff]  }
  0x1f   :  { %1664 = vmatpush1.bf16.msra.mxu0 %v3102_v30  ;;  %v3192_v30 = vld [vmem:[%s4467_s1 + $0x84] ss:$20 sps:$4 sm:$0xff]   ;;  %v3208_v46 = vld [vmem:[%s4467_s1 + $0x8] ss:$20 sps:$4 sm:$0xff]  }
  0x20   :  { %1705 = vmatpush1.bf16.msra.mxu1 %v3103_v31  ;;  %1665 = vmatprep.subr.bf16.mxu0 %v3104_v32  ;;  %v3195_v31 = vld [vmem:[%s4467_s1 + $0x52c] ss:$20 sps:$4 sm:$0xff]   ;;  %v3797_v32 = vld [vmem:[%s4466_s0 + $0x10] sm:$0xff] }
  0x21   :  { %1706 = vmatprep.subr.bf16.mxu1 %v3106_v33  ;;  %v3801_v33 = vcombine.high %v3797_v32, %v3797_v32 }
  0x23   :  { %1666 = vmatpush2.bf16.msra.mxu0 %v3108_v34  ;;  %v3190_v34 = vld [vmem:[%s4467_s1 + $0x80] ss:$20 sps:$4 sm:$0xff]  }
  0x24   :  { %1707 = vmatpush2.bf16.msra.mxu1 %v3109_v35  ;;  %1667 = vmatprep.subr.bf16.mxu0 %v3110_v36  ;;  %v3193_v35 = vld [vmem:[%s4467_s1 + $0x528] ss:$20 sps:$4 sm:$0xff]  }
  0x25   :  { %1708 = vmatprep.subr.bf16.mxu1 %v3112_v37  ;;  %v3198_v36 = vld [vmem:[%s4467_s1 + $0x5c] ss:$20 sps:$4 sm:$0xff]   ;;  %v3201_v37 = vld [vmem:[%s4467_s1 + $0x504] ss:$20 sps:$4 sm:$0xff]  }
  0x27   :  { %1668 = vmatpush2.bf16.msra.mxu0 %v3114_v38  ;;  %v3196_v38 = vld [vmem:[%s4467_s1 + $0x58] ss:$20 sps:$4 sm:$0xff]  }
  0x28   :  { %1709 = vmatpush2.bf16.msra.mxu1 %v3115_v39  ;;  %1669 = vmatprep.subr.bf16.mxu0 %v3116_v40  ;;  %v3199_v39 = vld [vmem:[%s4467_s1 + $0x500] ss:$20 sps:$4 sm:$0xff]  }
  0x29   :  { %1710 = vmatprep.subr.bf16.mxu1 %v3118_v41  ;;  %v3204_v40 = vld [vmem:[%s4467_s1 + $0x34] ss:$20 sps:$4 sm:$0xff]   ;;  %v3207_v41 = vld [vmem:[%s4467_s1 + $0x75c] ss:$20 sps:$4 sm:$0xff]  }
  0x2b   :  { %1670 = vmatpush2.bf16.msra.mxu0 %v3120_v42  ;;  %v3202_v42 = vld [vmem:[%s4467_s1 + $0x30] ss:$20 sps:$4 sm:$0xff]  }
  0x2c   :  { %1711 = vmatpush2.bf16.msra.mxu1 %v3121_v43  ;;  %1671 = vmatprep.subr.bf16.mxu0 %v3122_v44  ;;  %v3205_v43 = vld [vmem:[%s4467_s1 + $0x758] ss:$20 sps:$4 sm:$0xff]  }
  0x2d   :  { %1712 = vmatprep.subr.bf16.mxu1 %v3124_v45  ;;  %v3210_v44 = vld [vmem:[%s4467_s1 + $0xc] ss:$20 sps:$4 sm:$0xff]   ;;  %v3213_v45 = vld [vmem:[%s4467_s1 + $0x734] ss:$20 sps:$4 sm:$0xff]  }
  0x2f   :  { %1672 = vmatpush2.bf16.msra.mxu0 %v3126_v49  ;;  %v3216_v49 = vld [vmem:[%s4467_s1 + $0x264] ss:$20 sps:$4 sm:$0xff]  }
  0x30   :  { %1713 = vmatpush2.bf16.msra.mxu1 %v3127_v50  ;;  %1673 = vmatprep.subr.bf16.mxu0 %v3128_v52  ;;  %v3219_v50 = vld [vmem:[%s4467_s1 + $0x70c] ss:$20 sps:$4 sm:$0xff]  }
  0x31   :  { %1714 = vmatprep.subr.bf16.mxu1 %v3130_v53  ;;  %v3214_v52 = vld [vmem:[%s4467_s1 + $0x260] ss:$20 sps:$4 sm:$0xff]   ;;  %v3217_v53 = vld [vmem:[%s4467_s1 + $0x708] ss:$20 sps:$4 sm:$0xff]  }
  0x33   :  { %1674 = vmatpush2.bf16.msra.mxu0 %v3132_v54  ;;  %v3222_v54 = vld [vmem:[%s4467_s1 + $0x23c] ss:$20 sps:$4 sm:$0xff]  }
  0x34   :  { %1715 = vmatpush2.bf16.msra.mxu1 %v3133_v55  ;;  %1675 = vmatprep.subr.bf16.mxu0 %v3134_v56  ;;  %v3225_v55 = vld [vmem:[%s4467_s1 + $0x6e4] ss:$20 sps:$4 sm:$0xff]  }
  0x35   :  { %1716 = vmatprep.subr.bf16.mxu1 %v3136_v57  ;;  %v3220_v56 = vld [vmem:[%s4467_s1 + $0x238] ss:$20 sps:$4 sm:$0xff]   ;;  %v3223_v57 = vld [vmem:[%s4467_s1 + $0x6e0] ss:$20 sps:$4 sm:$0xff]  }
  0x37   :  { %1676 = vmatpush2.bf16.msra.mxu0 %v3138_v58  ;;  %v3228_v58 = vld [vmem:[%s4467_s1 + $0x214] ss:$20 sps:$4 sm:$0xff]  }
  0x38   :  { %1717 = vmatpush2.bf16.msra.mxu1 %v3139_v59  ;;  %1677 = vmatprep.subr.bf16.mxu0 %v3140_v60  ;;  %v3231_v59 = vld [vmem:[%s4467_s1 + $0x6bc] ss:$20 sps:$4 sm:$0xff]  }
  0x39   :  { %1718 = vmatprep.subr.bf16.mxu1 %v3142_v61  ;;  %v3226_v60 = vld [vmem:[%s4467_s1 + $0x210] ss:$20 sps:$4 sm:$0xff]   ;;  %v3229_v61 = vld [vmem:[%s4467_s1 + $0x6b8] ss:$20 sps:$4 sm:$0xff]  }
  0x3b   :  { %1678 = vmatpush2.bf16.msra.mxu0 %v3144_v62  ;;  %v3234_v62 = vld [vmem:[%s4467_s1 + $0x1ec] ss:$20 sps:$4 sm:$0xff]  }
  0x3c   :  { %1719 = vmatpush2.bf16.msra.mxu1 %v3145_v63  ;;  %1679 = vmatprep.subr.bf16.mxu0 %v3146_v0  ;;  %v3237_v63 = vld [vmem:[%s4467_s1 + $0x694] ss:$20 sps:$4 sm:$0xff]  }
  0x3d   :  { %1720 = vmatprep.subr.bf16.mxu1 %v3148_v1  ;;  %v3232_v0 = vld [vmem:[%s4467_s1 + $0x1e8] ss:$20 sps:$4 sm:$0xff]   ;;  %v3235_v1 = vld [vmem:[%s4467_s1 + $0x690] ss:$20 sps:$4 sm:$0xff]  }
  0x3f   :  { %1680 = vmatpush2.bf16.msra.mxu0 %v3150_v2  ;;  %v3240_v2 = vld [vmem:[%s4467_s1 + $0x1c4] ss:$20 sps:$4 sm:$0xff]  }
  0x40   :  { %1721 = vmatpush2.bf16.msra.mxu1 %v3151_v3  ;;  %1731 = vmatprep.subr.bf16.mxu0 %v3158_v4  ;;  %v3243_v3 = vld [vmem:[%s4467_s1 + $0x66c] ss:$20 sps:$4 sm:$0xff]  }
  0x41   :  { %1786 = vmatprep.subr.bf16.mxu1 %v3161_v5  ;;  %v3238_v4 = vld [vmem:[%s4467_s1 + $0x1c0] ss:$20 sps:$4 sm:$0xff]   ;;  %v3241_v5 = vld [vmem:[%s4467_s1 + $0x668] ss:$20 sps:$4 sm:$0xff]  }
  0x42   :  { %1682 = vmatmul.mubr.bf16.vlgmr.msra.gmra.mxu0 %v3713_v6 }
  0x43   :  { %1723 = vmatmul.mubr.bf16.vlgmr.msra.gmra.mxu1 %v3715_v7  ;;  %1732 = vmatpush1.bf16.msra.mxu0 %v3156_v8  ;;  %v3246_v8 = vld [vmem:[%s4467_s1 + $0x19c] ss:$20 sps:$4 sm:$0xff]  }
  0x44   :  { %1787 = vmatpush1.bf16.msra.mxu1 %v3159_v9  ;;  %1733 = vmatprep.subr.bf16.mxu0 %v3164_v10  ;;  %v3249_v9 = vld [vmem:[%s4467_s1 + $0x644] ss:$20 sps:$4 sm:$0xff]  }
  0x45   :  { %1804 = vmatprep.mubr.bf16.mxu1 %v3469_v13  ;;  %1813 = vmatprep.subr.bf16.mxu1 %v3167_v11  ;;  %v3244_v10 = vld [vmem:[%s4467_s1 + $0x198] ss:$20 sps:$4 sm:$0xff]   ;;  %v3247_v11 = vld [vmem:[%s4467_s1 + $0x640] ss:$20 sps:$4 sm:$0xff]  }
  0x46   :  { %1763 = vmatprep.mubr.bf16.mxu0 %v3801_v33 }
  0x47   :  { %1734 = vmatpush1.bf16.msra.mxu0 %v3162_v12  ;;  %v3254_v12 = vld [vmem:[%s4467_s1 + $0x174] ss:$20 sps:$4 sm:$0xff]  }
  0x48   :  { %1735 = vmatprep.subr.bf16.mxu0 %v3170_v14  ;;  %v3257_v14 = vld [vmem:[%s4467_s1 + $0x3a4] ss:$20 sps:$4 sm:$0xff]  }
  0x4b   :  { %2861 = vmatmul.mubr.msk.bf16.vlgmr.msra.gmra.mxu1 %vm1645_vm0, %v3747_v17  ;;  %1736 = vmatpush1.bf16.msra.mxu0 %v3168_v16  ;;  %v3252_v16 = vld [vmem:[%s4467_s1 + $0x170] ss:$20 sps:$4 sm:$0xff]  }
  0x4c   :  { %1814 = vmatpush1.bf16.msra.mxu1 %v3165_v15  ;;  %1737 = vmatprep.subr.bf16.mxu0 %v3177_v19  ;;  %v3926_v15 = vcombine.low %v3797_v32, %v3797_v32  ;;  %v3260_v19 = vld [vmem:[%s4467_s1 + $0x14c] ss:$20 sps:$4 sm:$0xff]   ;;  %v3281_v32 = vld [vmem:[%s4467_s1 + $0x304] ss:$20 sps:$4 sm:$0xff]  }
  0x4d   :  { %1815 = vmatprep.subr.bf16.mxu1 %v3174_v18  ;;  %1845 = vmatprep.mubr.bf16.mxu1 %v3644_v47  ;;  %v3255_v18 = vld [vmem:[%s4467_s1 + $0x3a0] ss:$20 sps:$4 sm:$0xff]  }
  0x4f   :  { %1738 = vmatpush1.bf16.msra.mxu0 %v3175_v21  ;;  %v3258_v21 = vld [vmem:[%s4467_s1 + $0x148] ss:$20 sps:$4 sm:$0xff]  }
  0x50   :  { %1816 = vmatpush1.bf16.msra.mxu1 %v3172_v20  ;;  %1739 = vmatprep.subr.bf16.mxu0 %v3183_v23  ;;  %v3263_v20 = vld [vmem:[%s4467_s1 + $0x37c] ss:$20 sps:$4 sm:$0xff]   ;;  %v3266_v23 = vld [vmem:[%s4467_s1 + $0x624] ss:$20 sps:$4 sm:$0xff]  }
  0x51   :  { %1817 = vmatprep.subr.bf16.mxu1 %v3180_v22  ;;  %v3261_v22 = vld [vmem:[%s4467_s1 + $0x378] ss:$20 sps:$4 sm:$0xff]  }
  0x53   :  { %1740 = vmatpush1.bf16.msra.mxu0 %v3181_v25  ;;  %v3264_v25 = vld [vmem:[%s4467_s1 + $0x620] ss:$20 sps:$4 sm:$0xff]  }
  0x54   :  { %1818 = vmatpush1.bf16.msra.mxu1 %v3178_v24  ;;  %1741 = vmatprep.subr.bf16.mxu0 %v3189_v27  ;;  %v3269_v24 = vld [vmem:[%s4467_s1 + $0x354] ss:$20 sps:$4 sm:$0xff]   ;;  %v3272_v27 = vld [vmem:[%s4467_s1 + $0x5fc] ss:$20 sps:$4 sm:$0xff]  }
  0x55   :  { %1819 = vmatprep.subr.bf16.mxu1 %v3186_v26  ;;  %v3267_v26 = vld [vmem:[%s4467_s1 + $0x350] ss:$20 sps:$4 sm:$0xff]  }
  0x57   :  { %1742 = vmatpush1.bf16.msra.mxu0 %v3187_v29  ;;  %v3270_v29 = vld [vmem:[%s4467_s1 + $0x5f8] ss:$20 sps:$4 sm:$0xff]  }
  0x58   :  { %1820 = vmatpush1.bf16.msra.mxu1 %v3184_v28  ;;  %1743 = vmatprep.subr.bf16.mxu0 %v3195_v31  ;;  %v3275_v28 = vld [vmem:[%s4467_s1 + $0x32c] ss:$20 sps:$4 sm:$0xff]   ;;  %v3278_v31 = vld [vmem:[%s4467_s1 + $0x5d4] ss:$20 sps:$4 sm:$0xff]  }
  0x59   :  { %1821 = vmatprep.subr.bf16.mxu1 %v3192_v30  ;;  %v3273_v30 = vld [vmem:[%s4467_s1 + $0x328] ss:$20 sps:$4 sm:$0xff]  }
  0x5b   :  { %1744 = vmatpush1.bf16.msra.mxu0 %v3193_v35  ;;  %v3279_v35 = vld [vmem:[%s4467_s1 + $0x300] ss:$20 sps:$4 sm:$0xff]  }
  0x5c   :  { %1822 = vmatpush1.bf16.msra.mxu1 %v3190_v34  ;;  %1745 = vmatprep.subr.bf16.mxu0 %v3201_v37  ;;  %v3276_v34 = vld [vmem:[%s4467_s1 + $0x5d0] ss:$20 sps:$4 sm:$0xff]  }
  0x5d   :  { %1823 = vmatprep.subr.bf16.mxu1 %v3198_v36  ;;  %v3284_v36 = vld [vmem:[%s4467_s1 + $0x5ac] ss:$20 sps:$4 sm:$0xff]   ;;  %v3287_v37 = vld [vmem:[%s4467_s1 + $0x2dc] ss:$20 sps:$4 sm:$0xff]  }
  0x5f   :  { %1746 = vmatpush1.bf16.msra.mxu0 %v3199_v39  ;;  %v3285_v39 = vld [vmem:[%s4467_s1 + $0x2d8] ss:$20 sps:$4 sm:$0xff]  }
  0x60   :  { %1824 = vmatpush1.bf16.msra.mxu1 %v3196_v38  ;;  %1747 = vmatprep.subr.bf16.mxu0 %v3207_v41  ;;  %v3282_v38 = vld [vmem:[%s4467_s1 + $0x5a8] ss:$20 sps:$4 sm:$0xff]  }
  0x61   :  { %1825 = vmatprep.subr.bf16.mxu1 %v3204_v40  ;;  %v3290_v40 = vld [vmem:[%s4467_s1 + $0x584] ss:$20 sps:$4 sm:$0xff]   ;;  %v3293_v41 = vld [vmem:[%s4467_s1 + $0x2b4] ss:$20 sps:$4 sm:$0xff]  }
  0x63   :  { %1748 = vmatpush2.bf16.msra.mxu0 %v3205_v43  ;;  %v3291_v43 = vld [vmem:[%s4467_s1 + $0x2b0] ss:$20 sps:$4 sm:$0xff]  }
  0x64   :  { %1826 = vmatpush1.bf16.msra.mxu1 %v3202_v42  ;;  %1749 = vmatprep.subr.bf16.mxu0 %v3213_v45  ;;  %v3288_v42 = vld [vmem:[%s4467_s1 + $0x580] ss:$20 sps:$4 sm:$0xff]  }
  0x65   :  { %1827 = vmatprep.subr.bf16.mxu1 %v3210_v44  ;;  %v3296_v44 = vld [vmem:[%s4467_s1 + $0x55c] ss:$20 sps:$4 sm:$0xff]   ;;  %v3299_v45 = vld [vmem:[%s4467_s1 + $0x28c] ss:$20 sps:$4 sm:$0xff]  }
  0x67   :  { %1750 = vmatpush2.bf16.msra.mxu0 %v3211_v48  ;;  %v3297_v48 = vld [vmem:[%s4467_s1 + $0x288] ss:$20 sps:$4 sm:$0xff]  }
  0x68   :  { %1828 = vmatpush1.bf16.msra.mxu1 %v3208_v46  ;;  %1751 = vmatprep.subr.bf16.mxu0 %v3219_v50  ;;  %v3294_v46 = vld [vmem:[%s4467_s1 + $0x558] ss:$20 sps:$4 sm:$0xff]  }
  0x69   :  { %1829 = vmatprep.subr.bf16.mxu1 %v3216_v49  ;;  %v3302_v49 = vld [vmem:[%s4467_s1 + $0x534] ss:$20 sps:$4 sm:$0xff]   ;;  %v3305_v50 = vld [vmem:[%s4467_s1 + $0x4e4] ss:$20 sps:$4 sm:$0xff]  }
  0x6b   :  { %1752 = vmatpush2.bf16.msra.mxu0 %v3217_v53  ;;  %v3303_v53 = vld [vmem:[%s4467_s1 + $0x4e0] ss:$20 sps:$4 sm:$0xff]  }
  0x6c   :  { %1830 = vmatpush2.bf16.msra.mxu1 %v3214_v52  ;;  %1753 = vmatprep.subr.bf16.mxu0 %v3225_v55  ;;  %v3300_v52 = vld [vmem:[%s4467_s1 + $0x530] ss:$20 sps:$4 sm:$0xff]  }
  0x6d   :  { %1831 = vmatprep.subr.bf16.mxu1 %v3222_v54  ;;  %v3308_v54 = vld [vmem:[%s4467_s1 + $0x50c] ss:$20 sps:$4 sm:$0xff]   ;;  %v3311_v55 = vld [vmem:[%s4467_s1 + $0x4bc] ss:$20 sps:$4 sm:$0xff]  }
  0x6f   :  { %1754 = vmatpush2.bf16.msra.mxu0 %v3223_v57  ;;  %v3309_v57 = vld [vmem:[%s4467_s1 + $0x4b8] ss:$20 sps:$4 sm:$0xff]  }
  0x70   :  { %1832 = vmatpush2.bf16.msra.mxu1 %v3220_v56  ;;  %1755 = vmatprep.subr.bf16.mxu0 %v3231_v59  ;;  %v3306_v56 = vld [vmem:[%s4467_s1 + $0x508] ss:$20 sps:$4 sm:$0xff]  }
  0x71   :  { %1833 = vmatprep.subr.bf16.mxu1 %v3228_v58  ;;  %v3314_v58 = vld [vmem:[%s4467_s1 + $0x764] ss:$20 sps:$4 sm:$0xff]   ;;  %v3317_v59 = vld [vmem:[%s4467_s1 + $0x494] ss:$20 sps:$4 sm:$0xff]  }
  0x73   :  { %1756 = vmatpush2.bf16.msra.mxu0 %v3229_v61  ;;  %v3315_v61 = vld [vmem:[%s4467_s1 + $0x490] ss:$20 sps:$4 sm:$0xff]  }
  0x74   :  { %1834 = vmatpush2.bf16.msra.mxu1 %v3226_v60  ;;  %1757 = vmatprep.subr.bf16.mxu0 %v3237_v63  ;;  %v3312_v60 = vld [vmem:[%s4467_s1 + $0x760] ss:$20 sps:$4 sm:$0xff]  }
  0x75   :  { %1835 = vmatprep.subr.bf16.mxu1 %v3234_v62  ;;  %v3320_v62 = vld [vmem:[%s4467_s1 + $0x73c] ss:$20 sps:$4 sm:$0xff]   ;;  %v3323_v63 = vld [vmem:[%s4467_s1 + $0x46c] ss:$20 sps:$4 sm:$0xff]  }
  0x77   :  { %1758 = vmatpush2.bf16.msra.mxu0 %v3235_v1  ;;  %v3321_v1 = vld [vmem:[%s4467_s1 + $0x468] ss:$20 sps:$4 sm:$0xff]  }
  0x78   :  { %1836 = vmatpush2.bf16.msra.mxu1 %v3232_v0  ;;  %1759 = vmatprep.subr.bf16.mxu0 %v3243_v3  ;;  %v3318_v0 = vld [vmem:[%s4467_s1 + $0x738] ss:$20 sps:$4 sm:$0xff]  }
  0x79   :  { %1837 = vmatprep.subr.bf16.mxu1 %v3240_v2  ;;  %v3326_v2 = vld [vmem:[%s4467_s1 + $0x714] ss:$20 sps:$4 sm:$0xff]   ;;  %v3329_v3 = vld [vmem:[%s4467_s1 + $0x444] ss:$20 sps:$4 sm:$0xff]  }
  0x7b   :  { %1760 = vmatpush2.bf16.msra.mxu0 %v3241_v5  ;;  %v3327_v5 = vld [vmem:[%s4467_s1 + $0x440] ss:$20 sps:$4 sm:$0xff]  }
  0x7c   :  { %1838 = vmatpush2.bf16.msra.mxu1 %v3238_v4  ;;  %1761 = vmatprep.subr.bf16.mxu0 %v3249_v9  ;;  %v3324_v4 = vld [vmem:[%s4467_s1 + $0x710] ss:$20 sps:$4 sm:$0xff]  }
  0x7d   :  { %1839 = vmatprep.subr.bf16.mxu1 %v3246_v8  ;;  %v3332_v8 = vld [vmem:[%s4467_s1 + $0x6ec] ss:$20 sps:$4 sm:$0xff]   ;;  %v3335_v9 = vld [vmem:[%s4467_s1 + $0x41c] ss:$20 sps:$4 sm:$0xff]  }
  0x7f   :  { %1762 = vmatpush2.bf16.msra.mxu0 %v3247_v11  ;;  %v3333_v11 = vld [vmem:[%s4467_s1 + $0x418] ss:$20 sps:$4 sm:$0xff]  }
  0x80   :  { %1840 = vmatpush2.bf16.msra.mxu1 %v3244_v10  ;;  %1854 = vmatprep.subr.bf16.mxu0 %v3257_v14  ;;  %v3330_v10 = vld [vmem:[%s4467_s1 + $0x6e8] ss:$20 sps:$4 sm:$0xff]  }
  0x81   :  { %1841 = vmatprep.subr.bf16.mxu1 %v3254_v12  ;;  %v3338_v12 = vld [vmem:[%s4467_s1 + $0x6c4] ss:$20 sps:$4 sm:$0xff]   ;;  %v3341_v14 = vld [vmem:[%s4467_s1 + $0x3f4] ss:$20 sps:$4 sm:$0xff]  }
  0x82   :  { %1764 = vmatmul.mubr.bf16.vlgmr.msra.gmra.mxu0 %v3926_v15 }
  0x83   :  { %1855 = vmatpush1.bf16.msra.mxu0 %v3255_v18  ;;  %1886 = vmatprep.mubr.bf16.mxu0 %v3655_v51  ;;  %v3339_v18 = vld [vmem:[%s4467_s1 + $0x3f0] ss:$20 sps:$4 sm:$0xff]  }
  0x84   :  { %1842 = vmatpush2.bf16.msra.mxu1 %v3252_v16  ;;  %1856 = vmatprep.subr.bf16.mxu0 %v3263_v20  ;;  %v3336_v16 = vld [vmem:[%s4467_s1 + $0x6c0] ss:$20 sps:$4 sm:$0xff]  }
  0x85   :  { %1843 = vmatprep.subr.bf16.mxu1 %v3260_v19  ;;  %v3344_v19 = vld [vmem:[%s4467_s1 + $0x69c] ss:$20 sps:$4 sm:$0xff]   ;;  %v3347_v20 = vld [vmem:[%s4467_s1 + $0x3cc] ss:$20 sps:$4 sm:$0xff]  }
  0x87   :  { %1857 = vmatpush1.bf16.msra.mxu0 %v3261_v22  ;;  %v3345_v22 = vld [vmem:[%s4467_s1 + $0x3c8] ss:$20 sps:$4 sm:$0xff]  }
  0x88   :  { %1844 = vmatpush2.bf16.msra.mxu1 %v3258_v21  ;;  %1858 = vmatprep.subr.bf16.mxu0 %v3269_v24  ;;  %v3342_v21 = vld [vmem:[%s4467_s1 + $0x698] ss:$20 sps:$4 sm:$0xff]  }
  0x89   :  { %1895 = vmatprep.subr.bf16.mxu1 %v3266_v23  ;;  %v3350_v23 = vld [vmem:[%s4467_s1 + $0x674] ss:$20 sps:$4 sm:$0xff]   ;;  %v3353_v24 = vld [vmem:[%s4467_s1 + $0x78c] ss:$20 sps:$4 sm:$0xff]  }
  0x8b   :  { %1846 = vmatmul.mubr.bf16.vlgmr.msra.gmra.mxu1 %v3713_v6  ;;  %1859 = vmatpush1.bf16.msra.mxu0 %v3267_v26  ;;  %v3351_v26 = vld [vmem:[%s4467_s1 + $0x788] ss:$20 sps:$4 sm:$0xff]  }
  0x8c   :  { %1896 = vmatpush1.bf16.msra.mxu1 %v3264_v25  ;;  %1860 = vmatprep.subr.bf16.mxu0 %v3275_v28  ;;  %v3348_v25 = vld [vmem:[%s4467_s1 + $0x670] ss:$20 sps:$4 sm:$0xff]   ;;  %v3354_v28 = vld [vmem:[%s4467_s1 + $0x648] ss:$20 sps:$4 sm:$0xff]  }
  0x8d   :  { %1897 = vmatprep.subr.bf16.mxu1 %v3272_v27  ;;  %1927 = vmatprep.mubr.bf16.mxu1 %v3801_v33  ;;  %v3356_v27 = vld [vmem:[%s4467_s1 + $0x64c] ss:$20 sps:$4 sm:$0xff]  }
  0x8f   :  { %1861 = vmatpush1.bf16.msra.mxu0 %v3273_v30  ;;  %v3359_v30 = vld [vmem:[%s4467_s1 + $0x4e8] ss:$20 sps:$4 sm:$0xff]  }
  0x90   :  { %1898 = vmatpush1.bf16.msra.mxu1 %v3270_v29  ;;  %1862 = vmatprep.subr.bf16.mxu0 %v3281_v32  ;;  %v3357_v29 = vld [vmem:[%s4467_s1 + $0x268] ss:$20 sps:$4 sm:$0xff]  }
  0x91   :  { %1899 = vmatprep.subr.bf16.mxu1 %v3278_v31  ;;  %v3358_v31 = vld [vmem:[%s4467_s1 + $0x128] ss:$20 sps:$4 sm:$0xff]  }
  0x92   :  { %v3360_v32 = vld [vmem:[%s4467_s1 + $0x3a8] ss:$20 sps:$4 sm:$0xff]  }
  0x93   :  { %1863 = vmatpush1.bf16.msra.mxu0 %v3279_v35  ;;  %v3363_v35 = vld [vmem:[%s4467_s1 + $0x4c0] ss:$20 sps:$4 sm:$0xff]  }
  0x94   :  { %1900 = vmatpush1.bf16.msra.mxu1 %v3276_v34  ;;  %1864 = vmatprep.subr.bf16.mxu0 %v3287_v37  ;;  %v3361_v34 = vld [vmem:[%s4467_s1 + $0x240] ss:$20 sps:$4 sm:$0xff]   ;;  %v3365_v37 = vld [vmem:[%s4467_s1 + $0x218] ss:$20 sps:$4 sm:$0xff]  }
  0x95   :  { %1901 = vmatprep.subr.bf16.mxu1 %v3284_v36  ;;  %v3364_v36 = vld [vmem:[%s4467_s1 + $0x380] ss:$20 sps:$4 sm:$0xff]  }
  0x97   :  { %1865 = vmatpush1.bf16.msra.mxu0 %v3285_v39  ;;  %v3366_v39 = vld [vmem:[%s4467_s1 + $0xd8] ss:$20 sps:$4 sm:$0xff]  }
  0x98   :  { %1902 = vmatpush1.bf16.msra.mxu1 %v3282_v38  ;;  %1866 = vmatprep.subr.bf16.mxu0 %v3293_v41  ;;  %v3367_v38 = vld [vmem:[%s4467_s1 + $0x498] ss:$20 sps:$4 sm:$0xff]   ;;  %v3371_v41 = vld [vmem:[%s4467_s1 + $0x470] ss:$20 sps:$4 sm:$0xff]  }
  0x99   :  { %1903 = vmatprep.subr.bf16.mxu1 %v3290_v40  ;;  %v3369_v40 = vld [vmem:[%s4467_s1 + $0x1f0] ss:$20 sps:$4 sm:$0xff]  }
  0x9b   :  { %1867 = vmatpush1.bf16.msra.mxu0 %v3291_v43  ;;  %v3375_v43 = vld [vmem:[%s4467_s1 + $0x448] ss:$20 sps:$4 sm:$0xff]  }
  0x9c   :  { %1904 = vmatpush1.bf16.msra.mxu1 %v3288_v42  ;;  %1868 = vmatprep.subr.bf16.mxu0 %v3299_v45  ;;  %v3373_v42 = vld [vmem:[%s4467_s1 + $0x1c8] ss:$20 sps:$4 sm:$0xff]  }
  0x9d   :  { %1905 = vmatprep.subr.bf16.mxu1 %v3296_v44  ;;  %v3374_v44 = vld [vmem:[%s4467_s1 + $0x88] ss:$20 sps:$4 sm:$0xff]  }
  0x9e   :  { %v3376_v45 = vld [vmem:[%s4467_s1 + $0x308] ss:$20 sps:$4 sm:$0xff]  }
  0x9f   :  { %1869 = vmatpush1.bf16.msra.mxu0 %v3297_v48 }
  0xa0   :  { %1906 = vmatpush1.bf16.msra.mxu1 %v3294_v46  ;;  %1870 = vmatprep.subr.bf16.mxu0 %v3305_v50 }
  0xa1   :  { %1907 = vmatprep.subr.bf16.mxu1 %v3302_v49 }
  0xa3   :  { %1871 = vmatpush2.bf16.msra.mxu0 %v3303_v53 }
  0xa4   :  { %1908 = vmatpush1.bf16.msra.mxu1 %v3300_v52  ;;  %1872 = vmatprep.subr.bf16.mxu0 %v3311_v55 }
  0xa5   :  { %1909 = vmatprep.subr.bf16.mxu1 %v3308_v54 }
  0xa7   :  { %1873 = vmatpush2.bf16.msra.mxu0 %v3309_v57 }
  0xa8   :  { %1910 = vmatpush1.bf16.msra.mxu1 %v3306_v56  ;;  %1874 = vmatprep.subr.bf16.mxu0 %v3317_v59 }
  0xa9   :  { %1911 = vmatprep.subr.bf16.mxu1 %v3314_v58 }
  0xab   :  { %1875 = vmatpush2.bf16.msra.mxu0 %v3315_v61 }
  0xac   :  { %1912 = vmatpush2.bf16.msra.mxu1 %v3312_v60  ;;  %1876 = vmatprep.subr.bf16.mxu0 %v3323_v63 }
  0xad   :  { %1913 = vmatprep.subr.bf16.mxu1 %v3320_v62 }
  0xaf   :  { %1877 = vmatpush2.bf16.msra.mxu0 %v3321_v1 }
  0xb0   :  { %1914 = vmatpush2.bf16.msra.mxu1 %v3318_v0  ;;  %1878 = vmatprep.subr.bf16.mxu0 %v3329_v3 }
  0xb1   :  { %1915 = vmatprep.subr.bf16.mxu1 %v3326_v2 }
  0xb3   :  { %1879 = vmatpush2.bf16.msra.mxu0 %v3327_v5 }
  0xb4   :  { %1916 = vmatpush2.bf16.msra.mxu1 %v3324_v4  ;;  %1880 = vmatprep.subr.bf16.mxu0 %v3335_v9 }
  0xb5   :  { %1917 = vmatprep.subr.bf16.mxu1 %v3332_v8 }
  0xb7   :  { %1881 = vmatpush2.bf16.msra.mxu0 %v3333_v11 }
  0xb8   :  { %1918 = vmatpush2.bf16.msra.mxu1 %v3330_v10  ;;  %1882 = vmatprep.subr.bf16.mxu0 %v3341_v14 }
  0xb9   :  { %1919 = vmatprep.subr.bf16.mxu1 %v3338_v12 }
  0xbb   :  { %1883 = vmatpush2.bf16.msra.mxu0 %v3339_v18 }
  0xbc   :  { %1920 = vmatpush2.bf16.msra.mxu1 %v3336_v16  ;;  %1884 = vmatprep.subr.bf16.mxu0 %v3347_v20 }
  0xbd   :  { %1921 = vmatprep.subr.bf16.mxu1 %v3344_v19 }
  0xbf   :  { %1885 = vmatpush2.bf16.msra.mxu0 %v3345_v22 }
  0xc0   :  { %1922 = vmatpush2.bf16.msra.mxu1 %v3342_v21  ;;  %1950 = vmatprep.subr.bf16.mxu0 %v3353_v24 }
  0xc1   :  { %1923 = vmatprep.subr.bf16.mxu1 %v3350_v23 }
  0xc2   :  { %1887 = vmatmul.mubr.bf16.vlgmr.msra.gmra.mxu0 %v3715_v7 }
  0xc3   :  { %1951 = vmatpush1.bf16.msra.mxu0 %v3351_v26  ;;  %1968 = vmatprep.mubr.bf16.mxu0 %v3469_v13  ;;  %v3362_v13 = vld [vmem:[%s4467_s1 + $0x100] ss:$20 sps:$4 sm:$0xff]  }
  0xc4   :  { %1924 = vmatpush2.bf16.msra.mxu1 %v3348_v25  ;;  %2905 = vmatprep.subr.bf16.mxu0 %v3357_v29 }
  0xc5   :  { %1925 = vmatprep.subr.bf16.mxu1 %v3356_v27 }
  0xc8   :  { %1926 = vmatpush2.bf16.msra.mxu1 %v3354_v28 }
  0xc9   :  { %2927 = vmatprep.subr.bf16.mxu1 %v3359_v30 }
  0xca   :  { %2862 = vmatmul.mubr.msk.bf16.vlgmr.msra.gmra.mxu0 %vm1645_vm0, %v3747_v17  ;;  %v3368_v17 = vld [vmem:[%s4467_s1 + $0x358] ss:$20 sps:$4 sm:$0xff]  }
  0xcb   :  { %1928 = vmatmul.mubr.bf16.vlgmr.msra.gmra.mxu1 %v3926_v15  ;;  %2906 = vmatpush3.bf16.msra.mxu0 %v3358_v31 }
  0xcc   :  { %2928 = vmatpush3.bf16.msra.mxu1 %v3360_v32  ;;  %2907 = vmatprep.subr.bf16.mxu0 %v3361_v34 }
  0xcd   :  { %2929 = vmatprep.subr.bf16.mxu1 %v3363_v35  ;;  %2009 = vmatprep.mubr.bf16.mxu0 %v3644_v47  ;;  %v3370_v47 = vld [vmem:[%s4467_s1 + $0xb0] ss:$20 sps:$4 sm:$0xff]  }
  0xce   :  { %2049 = vmatprep.mubr.bf16.mxu1 %v3655_v51  ;;  %v3372_v51 = vld [vmem:[%s4467_s1 + $0x330] ss:$20 sps:$4 sm:$0xff]  }
  0xcf   :  { %2908 = vmatpush3.bf16.msra.mxu0 %v3362_v13 }
  0xd0   :  { %2930 = vmatpush3.bf16.msra.mxu1 %v3364_v36  ;;  %2909 = vmatprep.subr.bf16.mxu0 %v3365_v37 }
  0xd1   :  { %2931 = vmatprep.subr.bf16.mxu1 %v3367_v38 }
  0xd3   :  { %2910 = vmatpush3.bf16.msra.mxu0 %v3366_v39 }
  0xd4   :  { %2932 = vmatpush3.bf16.msra.mxu1 %v3368_v17  ;;  %2911 = vmatprep.subr.bf16.mxu0 %v3369_v40 }
  0xd5   :  { %2933 = vmatprep.subr.bf16.mxu1 %v3371_v41 }
  0xd7   :  { %2912 = vmatpush3.bf16.msra.mxu0 %v3370_v47 }
  0xd8   :  { %2934 = vmatpush3.bf16.msra.mxu1 %v3372_v51 }
  0xd9   :  { %10 = vsyncpa [#allocation3], 0  ;;  %2913 = vmatprep.subr.bf16.mxu0 %v3373_v42  ;;  %2935 = vmatprep.subr.bf16.mxu1 %v3375_v43  ;;  %v3377_v46 = vld [vmem:[%s4467_s1 + $0x1a0] ss:$20 sps:$4 sm:$0xff]   ;;  %v3381_v52 = vld [vmem:[%s4467_s1 + $0x178] ss:$20 sps:$4 sm:$0xff]  }
  0xda   :  { %v3379_v48 = vld [vmem:[%s4467_s1 + $0x420] ss:$20 sps:$4 sm:$0xff]   ;;  %v3383_v53 = vld [vmem:[%s4467_s1 + $0x3f8] ss:$20 sps:$4 sm:$0xff]   ;;  %v3385_v56 = vld [vmem:[%s4467_s1 + $0x150] ss:$20 sps:$4 sm:$0xff]  }
  0xdb   :  { %2914 = vmatpush3.bf16.msra.mxu0 %v3374_v44  ;;  %v3378_v49 = vld [vmem:[%s4467_s1 + $0x60] ss:$20 sps:$4 sm:$0xff]   ;;  %v3382_v54 = vld [vmem:[%s4467_s1 + $0x38] ss:$20 sps:$4 sm:$0xff]   ;;  %v3387_v57 = vld [vmem:[%s4467_s1 + $0x3d0] ss:$20 sps:$4 sm:$0xff]  }
  0xdc   :  { %2936 = vmatpush3.bf16.msra.mxu1 %v3376_v45  ;;  %v3380_v50 = vld [vmem:[%s4467_s1 + $0x2e0] ss:$20 sps:$4 sm:$0xff]   ;;  %2915 = vmatprep.subr.bf16.mxu0 %v3377_v46  ;;  %v3384_v55 = vld [vmem:[%s4467_s1 + $0x2b8] ss:$20 sps:$4 sm:$0xff]   ;;  %v3386_v58 = vld [vmem:[%s4467_s1 + $0x10] ss:$20 sps:$4 sm:$0xff]  }
  0xdd   :  { %2937 = vmatprep.subr.bf16.mxu1 %v3379_v48  ;;  %v3388_v59 = vld [vmem:[%s4467_s1 + $0x290] ss:$20 sps:$4 sm:$0xff]   ;;  %v3389_v60 = vld [vmem:[%s4467_s1 + $0x768] ss:$20 sps:$4 sm:$0xff]   ;;  %v3391_v63 = vld [vmem:[%s4467_s1 + $0x740] ss:$20 sps:$4 sm:$0xff]  }
  0xde   :  { %v3390_v61 = vld [vmem:[%s4467_s1 + $0x628] ss:$20 sps:$4 sm:$0xff]   ;;  %v3405_v62 = vld [vmem:[%s4467_s1 + $0x790] ss:$20 sps:$4 sm:$0xff]   ;;  %v3470_v0 = vmov 0.0   ;;  %vm3471_vm1 = vmmov 0  }
  0xdf   :  { %2916 = vmatpush3.bf16.msra.mxu0 %v3378_v49  ;;  %v3406_v1 = vld [vmem:[%s4469_s3 + $0x78] sm:$0xff]   ;;  %v3392_v2 = vld [vmem:[%s4467_s1 + $0x600] ss:$20 sps:$4 sm:$0xff]   ;;  %v3395_v4 = vld [vmem:[%s4467_s1 + $0x6f0] ss:$20 sps:$4 sm:$0xff]  }
  0xe0   :  { %2938 = vmatpush3.bf16.msra.mxu1 %v3380_v50  ;;  %2917 = vmatprep.subr.bf16.mxu0 %v3381_v52  ;;  %v3393_v3 = vld [vmem:[%s4467_s1 + $0x718] ss:$20 sps:$4 sm:$0xff]   ;;  %v3396_v8 = vld [vmem:[%s4467_s1 + $0x5b0] ss:$20 sps:$4 sm:$0xff]   ;;  %v3397_v10 = vld [vmem:[%s4467_s1 + $0x6c8] ss:$20 sps:$4 sm:$0xff]  }
  0xe1   :  { %2939 = vmatprep.subr.bf16.mxu1 %v3383_v53  ;;  %v3446_v5 = vld [vmem:[%s4466_s0 + $0x18] ss:$0 sps:$4 sm:$0xff]   ;;  %v3409_v9 = vld [vmem:[%s4469_s3 + $0x30] sm:$0xff]   ;;  %v3410_v11 = vld [vmem:[%s4469_s3 + $0x68] sm:$0xff]  }
  0xe2   :  { %v3398_v12 = vld [vmem:[%s4467_s1 + $0x588] ss:$20 sps:$4 sm:$0xff]   ;;  %v3399_v16 = vld [vmem:[%s4467_s1 + $0x6a0] ss:$20 sps:$4 sm:$0xff]   ;;  %v3401_v21 = vld [vmem:[%s4467_s1 + $0x678] ss:$20 sps:$4 sm:$0xff]  }
  0xe3   :  { %2918 = vmatpush3.bf16.msra.mxu0 %v3382_v54  ;;  %v3411_v14 = vld [vmem:[%s4469_s3 + $0x28] sm:$0xff]   ;;  %v3412_v18 = vld [vmem:[%s4469_s3 + $0x60] sm:$0xff]   ;;  %v3414_v22 = vld [vmem:[%s4469_s3 + $0x58] sm:$0xff]  }
  0xe4   :  { %2940 = vmatpush3.bf16.msra.mxu1 %v3384_v55  ;;  %2919 = vmatprep.subr.bf16.mxu0 %v3385_v56  ;;  %v3400_v19 = vld [vmem:[%s4467_s1 + $0x560] ss:$20 sps:$4 sm:$0xff]   ;;  %v3402_v23 = vld [vmem:[%s4467_s1 + $0x538] ss:$20 sps:$4 sm:$0xff]   ;;  %v3403_v25 = vld [vmem:[%s4467_s1 + $0x650] ss:$20 sps:$4 sm:$0xff]  }
  0xe5   :  { %2941 = vmatprep.subr.bf16.mxu1 %v3387_v57  ;;  %v3413_v20 = vld [vmem:[%s4469_s3 + $0x20] sm:$0xff]   ;;  %v3415_v24 = vld [vmem:[%s4469_s3 + $0x18] sm:$0xff]   ;;  %v3416_v26 = vld [vmem:[%s4469_s3 + $0x50] sm:$0xff]  }
  0xe6   :  { %v3404_v29 = vld [vmem:[%s4467_s1 + $0x510] ss:$20 sps:$4 sm:$0xff]   ;;  %v3418_v34 = vld [vmem:[%s4469_s3 + $0x48] sm:$0xff]   ;;  %v3422_v35 = vld [vmem:[%s4469_s3 + $0xf8] sm:$0xff]  }
  0xe7   :  { %2920 = vmatpush3.bf16.msra.mxu0 %v3386_v58  ;;  %v3417_v30 = vld [vmem:[%s4469_s3 + $0x10] sm:$0xff]   ;;  %v3419_v37 = vld [vmem:[%s4469_s3 + $0x8] sm:$0xff]   ;;  %v3423_v38 = vld [vmem:[%s4469_s3 + $0xb8] sm:$0xff]  }
  0xe8   :  { %2942 = vmatpush3.bf16.msra.mxu1 %v3388_v59  ;;  %2949 = vmatprep.subr.bf16.mxu0 %v3389_v60  ;;  %v3420_v40 = vld [vmem:[%s4469_s3 + $0x40] sm:$0xff]   ;;  %v3424_v41 = vld [vmem:[%s4469_s3 + $0xf0] sm:$0xff]   ;;  %v3426_v44 = vld [vmem:[%s4469_s3 + $0xe8] sm:$0xff]   ;;  %v322_v59 = vlaneseq }
  0xe9   :  { %3026 = vmatprep.subr.bf16.mxu1 %v3470_v0  ;;  %v3421_v51 = vld [vmem:[%s4469_s3] sm:$0xff]   ;;  %v3425_v42 = vld [vmem:[%s4469_s3 + $0xb0] sm:$0xff]   ;;  %v3430_v50 = vld [vmem:[%s4469_s3 + $0xd8] sm:$0xff]  }
  0xea   :  { %2010 = vmatmul.mubr.bf16.vlgmr.msra.gmra.mxu0 %v3713_v6  ;;  %v3394_v6 = vld [vmem:[%s4467_s1 + $0x5d8] ss:$20 sps:$4 sm:$0xff]   ;;  %v3428_v48 = vld [vmem:[%s4469_s3 + $0xe0] sm:$0xff]   ;;  %v3432_v53 = vld [vmem:[%s4469_s3 + $0xd0] sm:$0xff]   ;;  %v4406_v60 = vshrl.u32 %v322_v59, 7  ;;  %s3472_s1 = smov [#allocation2]  }
  0xeb   :  { %2050 = vmatmul.mubr.bf16.vlgmr.msra.gmra.mxu1 %v3715_v7  ;;  %2950 = vmatpush3.bf16.msra.mxu0 %v3390_v61  ;;  %v3407_v7 = vld [vmem:[%s4469_s3 + $0x38] sm:$0xff]   ;;  %v3429_v49 = vld [vmem:[%s4469_s3 + $0xa0] sm:$0xff]   ;;  %v3433_v54 = vld [vmem:[%s4469_s3 + $0x90] sm:$0xff]   ;;  %s2601_s19 = sshll.u32 %s3472_s1, 4  ;;  %s2602_s19 = int_to_ptr.vmem [resolvable:$true] %s2601_s19 }
  0xec   :  { %3027 = vmatpush3.bf16.msra.mxu1 %v3405_v62  ;;  %2951 = vmatprep.subr.bf16.mxu0 %v3391_v63  ;;  %v3431_v52 = vld [vmem:[%s4469_s3 + $0x98] sm:$0xff]   ;;  %v3434_v55 = vld [vmem:[%s4469_s3 + $0xc8] sm:$0xff]   ;;  %v3436_v57 = vld [vmem:[%s4469_s3 + $0xc0] sm:$0xff]   ;;  %v324_v61 = vsub.s32 0, %v4406_v60  ;;  %v328_v63 = vsub.s32 1, %v4406_v60  ;;  %s3447_s20 = scalar_lea.vmem %s2602_s19, 128  ;;  %p3452_p1 = scmp.lt.s32.totalorder %s2602_s19, %s2602_s19 }
  0xed   :  { %2089 = vmatprep.mubr.bf16.mxu0 %v3801_v33  ;;  %3028 = vmatprep.mubr.msk.bf16.mxu1 %vm3471_vm1, %v3470_v0  ;;  %v3408_v33 = vld [vmem:[%s4469_s3 + $0x70] sm:$0xff]   ;;  %v3435_v56 = vld [vmem:[%s4469_s3 + $0x88] sm:$0xff]   ;;  %v3437_v58 = vld [vmem:[%s4469_s3 + $0x80] sm:$0xff]   ;;  %p3448_p0 = scmp.ne.s32.totalorder %s2602_s19, %s3447_s20  ;;  %p3453_p2 = scmp.lt.s32.totalorder %s3447_s20, %s3447_s20 }
  0xee   :  { %2973 = vmatprep.subr.bf16.mxu1 %v3406_v1  ;;  %v4412_v62 = vld [vmem:[%s4468_s2] sm:$0x1f] }
  0xef   :  { %2952 = vmatpush3.bf16.msra.mxu0 %v3392_v2  ;;  %v325_v1 = vrot.slane %v4412_v62, %v324_v61  ;;  %v329_v2 = vrot.slane %v4412_v62, %v328_v63  ;;  %p3454_p3 = por %p3453_p2, %p3452_p1 }
  0xf0   :  { %2953 = vmatprep.subr.bf16.mxu0 %v3393_v3 }
  0xf1   :  { %p3455_p4 = pnand %p3454_p3, %p3448_p0 }
  0xf3   :  { %3029 = vmatmul.mubr.msk.bf16.vlgmr.msra.gmra.mxu1 %vm1645_vm0, %v3446_v5  ;;  %2954 = vmatpush3.bf16.msra.mxu0 %v3394_v6 }
  0xf4   :  { %2974 = vmatpush3.bf16.msra.mxu1 %v3407_v7  ;;  %2955 = vmatprep.subr.bf16.mxu0 %v3395_v4 }
  0xf5   :  { %2975 = vmatprep.subr.bf16.mxu1 %v3408_v33 }
  0xf7   :  { %2956 = vmatpush3.bf16.msra.mxu0 %v3396_v8 }
  0xf8   :  { %2976 = vmatpush3.bf16.msra.mxu1 %v3409_v9  ;;  %2957 = vmatprep.subr.bf16.mxu0 %v3397_v10 }
  0xf9   :  { %2977 = vmatprep.subr.bf16.mxu1 %v3410_v11 }
  0xfb   :  { %2958 = vmatpush3.bf16.msra.mxu0 %v3398_v12 }
  0xfc   :  { %2978 = vmatpush3.bf16.msra.mxu1 %v3411_v14  ;;  %2959 = vmatprep.subr.bf16.mxu0 %v3399_v16 }
  0xfd   :  { %2979 = vmatprep.subr.bf16.mxu1 %v3412_v18 }
  0xff   :  { %2960 = vmatpush3.bf16.msra.mxu0 %v3400_v19 }
 0x100   :  { %2980 = vmatpush3.bf16.msra.mxu1 %v3413_v20  ;;  %2961 = vmatprep.subr.bf16.mxu0 %v3401_v21  ;;  %v3438_v21 = vld [vmem:[%s4469_s3 + $0x138] sm:$0xff]  }
 0x101   :  { %2981 = vmatprep.subr.bf16.mxu1 %v3414_v22 }
 0x102   :  { %v4330_v27 = vpop.f32.mrf.mxu0 }
 0x103   :  { %v4332_v28 = vpop.f32.mrf.mxu1  ;;  %2962 = vmatpush3.bf16.msra.mxu0 %v3402_v23  ;;  %v1684_v3 = vadd.f32 %v4330_v27, %v325_v1  ;;  %v3440_v27 = vld [vmem:[%s4469_s3 + $0x128] sm:$0xff]  }
 0x104   :  { %2982 = vmatpush3.bf16.msra.mxu1 %v3415_v24  ;;  %v4340_v31 = vpop.f32.mrf.mxu0  ;;  %2963 = vmatprep.subr.bf16.mxu0 %v3403_v25  ;;  %v3439_v25 = vld [vmem:[%s4469_s3 + $0x130] sm:$0xff]  }
 0x105   :  { %v4342_v32 = vpop.f32.mrf.mxu1  ;;  %2983 = vmatprep.subr.bf16.mxu1 %v3416_v26  ;;  %v1686_v6 = vadd.f32 %v4340_v31, %v329_v2  ;;  %v1725_v7 = vadd.f32 %v4332_v28, %v1684_v3  ;;  %v3441_v28 = vld [vmem:[%s4469_s3 + $0x120] sm:$0xff]   ;;  %v3444_v31 = vld [vmem:[%s4469_s3 + $0x108] sm:$0xff]  }
 0x106   :  { %v1687_v13 = vpop.f32.mrf.mxu0 }
 0x107   :  { %v1728_v36 = vpop.f32.mrf.mxu1  ;;  %2964 = vmatpush3.bf16.msra.mxu0 %v3404_v29  ;;  %v1727_v33 = vadd.f32 %v4342_v32, %v1686_v6  ;;  %v3442_v29 = vld [vmem:[%s4469_s3 + $0x118] sm:$0xff]   ;;  %v3445_v32 = vld [vmem:[%s4469_s3 + $0x100] sm:$0xff]  }
 0x108   :  { %2984 = vmatpush3.bf16.msra.mxu1 %v3417_v30  ;;  %v1688_v39 = vpop.f32.mrf.mxu0  ;;  %2995 = vmatprep.subr.bf16.mxu0 %v3422_v35  ;;  %v3443_v30 = vld [vmem:[%s4469_s3 + $0x110] sm:$0xff]   ;;  %v336_v35 = vsub.s32 3, %v4406_v60 }
 0x109   :  { %v1729_v17 = vpop.f32.mrf.mxu1  ;;  %2985 = vmatprep.subr.bf16.mxu1 %v3418_v34  ;;  %v332_v34 = vsub.s32 2, %v4406_v60 }
 0x10a   :  { %2090 = vmatmul.mubr.bf16.vlgmr.msra.gmra.mxu0 %v3926_v15  ;;  %v3427_v15 = vld [vmem:[%s4469_s3 + $0xa8] sm:$0xff]  }
 0x10b   :  { %v1806_v47 = vpop.f32.mrf.mxu1  ;;  %2996 = vmatpush3.bf16.msra.mxu0 %v3423_v38  ;;  %v333_v36 = vrot.slane %v4412_v62, %v332_v34  ;;  %v337_v38 = vrot.slane %v4412_v62, %v336_v35  ;;  %v2864_v34 = vld [vmem:[%s4470_s4] ss:$0 sm:$0xff] }
 0x10c   :  { %2986 = vmatpush3.bf16.msra.mxu1 %v3419_v37  ;;  %2997 = vmatprep.subr.bf16.mxu0 %v3424_v41 }
 0x10d   :  { %v1808_v43 = vpop.f32.mrf.mxu1  ;;  %2987 = vmatprep.subr.bf16.mxu1 %v3420_v40 }
 0x10f   :  { %v1810_v45 = vpop.f32.mrf.mxu1  ;;  %2998 = vmatpush3.bf16.msra.mxu0 %v3425_v42 }
 0x110   :  { %2988 = vmatpush3.bf16.msra.mxu1 %v3421_v51  ;;  %2999 = vmatprep.subr.bf16.mxu0 %v3426_v44 }
 0x111   :  { %v1811_v46 = vpop.f32.mrf.mxu1  ;;  %3032 = vmatprep.subr.bf16.mxu1 %v3470_v0 }
 0x113   :  { %3000 = vmatpush3.bf16.msra.mxu0 %v3427_v15 }
 0x114   :  { %3001 = vmatprep.subr.bf16.mxu0 %v3428_v48 }
 0x117   :  { %3002 = vmatpush3.bf16.msra.mxu0 %v3429_v49 }
 0x118   :  { %3003 = vmatprep.subr.bf16.mxu0 %v3430_v50 }
 0x11b   :  { %3004 = vmatpush3.bf16.msra.mxu0 %v3431_v52 }
 0x11c   :  { %3005 = vmatprep.subr.bf16.mxu0 %v3432_v53 }
 0x11f   :  { %3006 = vmatpush3.bf16.msra.mxu0 %v3433_v54 }
 0x120   :  { %3007 = vmatprep.subr.bf16.mxu0 %v3434_v55 }
 0x123   :  { %3008 = vmatpush3.bf16.msra.mxu0 %v3435_v56 }
 0x124   :  { %3009 = vmatprep.subr.bf16.mxu0 %v3436_v57 }
 0x127   :  { %3010 = vmatpush3.bf16.msra.mxu0 %v3437_v58 }
 0x142   :  { %v1765_v4 = vpop.f32.mrf.mxu0 }
 0x143   :  { %v1766_v5 = vadd.f32 %v1765_v4, %v1725_v7 }
 0x144   :  { %v1767_v8 = vpop.f32.mrf.mxu0 }
 0x145   :  { %v1807_v9 = vadd.f32 %v1806_v47, %v1766_v5  ;;  %v1768_v10 = vadd.f32 %v1767_v8, %v1727_v33  ;;  %v340_v8 = vsub.s32 4, %v4406_v60 }
 0x146   :  { %v1769_v11 = vpop.f32.mrf.mxu0 }
 0x147   :  { %v1809_v12 = vadd.f32 %v1808_v43, %v1768_v10  ;;  %v2137_v14 = vmax.f32 %v1807_v9, 0.0  ;;  %v341_v9 = vrot.slane %v4412_v62, %v340_v8 }
 0x148   :  { %v1770_v16 = vpop.f32.mrf.mxu0 }
 0x149   :  { %v2138_v18 = vmax.f32 %v1809_v12, 0.0  ;;  %v2142_v22 = vpack.c.bf16 %v2137_v14, %v2137_v14 }
 0x14b   :  { %v1847_v19 = vpop.f32.mrf.mxu1  ;;  %v2143_v20 = vpack.c.bf16 %v2138_v18, %v2138_v18 }
 0x14c   :  { %v1848_v17 = vadd.f32 %v1847_v19, %v333_v36 }
 0x14d   :  { %v1849_v23 = vpop.f32.mrf.mxu1  ;;  %2506 = vmatprep.mubr.bf16.mxu1 %v2143_v20 }
 0x14e   :  { %2507 = vmatmul.mubr.bf16.vlgmr.msra.gmra.mxu1 %v2142_v22  ;;  %v1850_v41 = vadd.f32 %v1849_v23, %v337_v38 }
 0x14f   :  { %v1851_v24 = vpop.f32.mrf.mxu1  ;;  %3033 = vmatpush3.bf16.msra.mxu1 %v3438_v21  ;;  %3048 = vmatprep.mubr.msk.bf16.mxu1 %vm3471_vm1, %v3470_v0 }
 0x150   :  { %3034 = vmatprep.subr.bf16.mxu1 %v3470_v0 }
 0x151   :  { %v1852_v26 = vpop.f32.mrf.mxu1 }
 0x153   :  { %3035 = vmatpush3.bf16.msra.mxu1 %v3439_v25 }
 0x154   :  { %3036 = vmatprep.subr.bf16.mxu1 %v3470_v0 }
 0x157   :  { %3037 = vmatpush3.bf16.msra.mxu1 %v3440_v27 }
 0x158   :  { %3038 = vmatprep.subr.bf16.mxu1 %v3470_v0 }
 0x15b   :  { %3039 = vmatpush3.bf16.msra.mxu1 %v3441_v28 }
 0x15c   :  { %3040 = vmatprep.subr.bf16.mxu1 %v3470_v0 }
 0x15f   :  { %3041 = vmatpush3.bf16.msra.mxu1 %v3442_v29 }
 0x160   :  { %3042 = vmatprep.subr.bf16.mxu1 %v3470_v0 }
 0x163   :  { %3043 = vmatpush3.bf16.msra.mxu1 %v3443_v30 }
 0x164   :  { %3044 = vmatprep.subr.bf16.mxu1 %v3470_v0 }
 0x167   :  { %3045 = vmatpush3.bf16.msra.mxu1 %v3444_v31 }
 0x168   :  { %3046 = vmatprep.subr.bf16.mxu1 %v3470_v0 }
 0x16b   :  { %3047 = vmatpush3.bf16.msra.mxu1 %v3445_v32 }
 0x182   :  { %v1888_v13 = vpop.f32.mrf.mxu0 }
 0x183   :  { %v1889_v47 = vadd.f32 %v1888_v13, %v1848_v17 }
 0x184   :  { %v1890_v37 = vpop.f32.mrf.mxu0 }
 0x185   :  { %v1891_v43 = vadd.f32 %v1890_v37, %v1850_v41 }
 0x186   :  { %v1892_v39 = vpop.f32.mrf.mxu0 }
 0x188   :  { %v1893_v40 = vpop.f32.mrf.mxu0 }
 0x18a   :  { %v1970_v42 = vpop.f32.mrf.mxu0 }
 0x18b   :  { %v1929_v51 = vpop.f32.mrf.mxu1 }
 0x18c   :  { %v1930_v0 = vadd.f32 %v1929_v51, %v1889_v47  ;;  %v1972_v45 = vpop.f32.mrf.mxu0 }
 0x18d   :  { %v1931_v44 = vpop.f32.mrf.mxu1 }
 0x18e   :  { %v1971_v15 = vadd.f32 %v1970_v42, %v1930_v0  ;;  %v1932_v46 = vadd.f32 %v1931_v44, %v1891_v43  ;;  %v1974_v48 = vpop.f32.mrf.mxu0 }
 0x18f   :  { %v1933_v49 = vpop.f32.mrf.mxu1 }
 0x190   :  { %v1973_v50 = vadd.f32 %v1972_v45, %v1932_v46  ;;  %v2139_v52 = vmax.f32 %v1971_v15, 0.0  ;;  %v1975_v53 = vpop.f32.mrf.mxu0 }
 0x191   :  { %v1934_v54 = vpop.f32.mrf.mxu1 }
 0x192   :  { %v2140_v55 = vmax.f32 %v1973_v50, 0.0  ;;  %v2144_v57 = vpack.c.bf16 %v2139_v52, %v2139_v52 }
 0x194   :  { %v2145_v56 = vpack.c.bf16 %v2140_v55, %v2140_v55 }
 0x196   :  { %2546 = vmatprep.mubr.bf16.mxu0 %v2145_v56 }
 0x197   :  { %2547 = vmatmul.mubr.bf16.vlgmr.msra.gmra.mxu0 %v2144_v57 }
 0x1aa   :  { %v2921_v58 = vpop.f32.mrf.mxu0 }
 0x1ab   :  { %v2943_v59 = vpop.f32.mrf.mxu1 }
 0x1ac   :  { %v2922_v61 = vpop.f32.mrf.mxu0 }
 0x1ad   :  { %v2944_v63 = vpop.f32.mrf.mxu1  ;;  %v2923_v10 = vadd.f32 %v2922_v61, %v2921_v58 }
 0x1ae   :  { %v2924_v1 = vpop.f32.mrf.mxu0  ;;  %v2945_v12 = vadd.f32 %v2944_v63, %v2943_v59 }
 0x1af   :  { %v2946_v2 = vpop.f32.mrf.mxu1  ;;  %v2012_v11 = vadd.f32 %v2923_v10, %v341_v9 }
 0x1b0   :  { %v2925_v3 = vpop.f32.mrf.mxu0 }
 0x1b1   :  { %v2947_v6 = vpop.f32.mrf.mxu1  ;;  %v2052_v18 = vadd.f32 %v2945_v12, %v2012_v11 }
 0x1b3   :  { %v2131_v7 = vpop.f32.mrf.mxu1 }
 0x1b5   :  { %v3030_v4 = vpop.f32.mrf.mxu1 }
 0x1b7   :  { %v2134_v33 = vpop.f32.mrf.mxu1 }
 0x1b9   :  { %v3031_v5 = vpop.f32.mrf.mxu1 }
 0x1ca   :  { %v2965_v14 = vpop.f32.mrf.mxu0 }
 0x1cc   :  { %v2966_v16 = vpop.f32.mrf.mxu0 }
 0x1cd   :  { %v2967_v19 = vadd.f32 %v2966_v16, %v2965_v14 }
 0x1ce   :  { %v2968_v20 = vpop.f32.mrf.mxu0 }
 0x1cf   :  { %v2092_v21 = vadd.f32 %v2967_v19, %v2052_v18 }
 0x1d0   :  { %v2969_v22 = vpop.f32.mrf.mxu0 }
 0x1d1   :  { %v2132_v23 = vadd.f32 %v2131_v7, %v2092_v21 }
 0x1d3   :  { %v2141_v24 = vmax.f32 %v2132_v23, 0.0 }
 0x1d5   :  { %v2146_v25 = vpack.c.bf16 %v2141_v24, %v2141_v24 }
 0x1d7   :  { %3049 = vmatmul.mubr.bf16.vlgmr.msra.gmra.mxu1 %v2146_v25 }
 0x20e   :  { %v2989_v26 = vpop.f32.mrf.mxu1 }
 0x210   :  { %v2990_v27 = vpop.f32.mrf.mxu1 }
 0x211   :  { %v2991_v28 = vadd.f32 %v2990_v27, %v2989_v26 }
 0x212   :  { %v2992_v60 = vpop.f32.mrf.mxu1 }
 0x213   :  { %v2509_v13 = vadd.f32 %v2991_v28, %v2864_v34 }
 0x214   :  { %v2993_v29 = vpop.f32.mrf.mxu1 }
 0x257   :  { %v3011_v62 = vpop.f32.mrf.mxu0 }
 0x259   :  { %v3012_v30 = vpop.f32.mrf.mxu0 }
 0x25a   :  { %v3013_v35 = vadd.f32 %v3012_v30, %v3011_v62 }
 0x25b   :  { %v3014_v31 = vpop.f32.mrf.mxu0 }
 0x25c   :  { %v2549_v36 = vadd.f32 %v3013_v35, %v2509_v13 }
 0x25d   :  { %v3015_v32 = vpop.f32.mrf.mxu0 }
 0x297   :  { %v2588_v37 = vpop.f32.mrf.mxu1 }
 0x298   :  { %v2589_v38 = vadd.f32 %v2588_v37, %v2549_v36 }
 0x299   :  { %v3050_v39 = vpop.f32.mrf.mxu1 }
 0x29a   :  { %2594 = vst [vmem:[#allocation2] sm:$0xff] %v2589_v38 }
 0x29b   :  { %v2591_v17 = vpop.f32.mrf.mxu1 }
 0x29c   :  { %3458 = shalt.err (!%p3455_p4)
}
 0x29d   :  { %2604 = dma.vmem_to_hbm [thread:$0]  %s2602_s19, 128, %s4471_s5, [#allocation3]   ;;  %v3051_v40 = vpop.f32.mrf.mxu1 }
 0x29e   :  { %3467 = dma.done.wait [#allocation3], 128  }
 0x29f   :  { %3468 = vsyncadd [#allocation3], 4294967168 }
 0x2a0   :  { %2608 = vsyncpa [#allocation3], 1 }

</bundles_post_ra>
